<compile_context>
chip_gen: v7x
topology: tpu7x:2x2x1
jax: 0.10.0
libtpu: 0.0.40
codegen_flags: <defaults>
</compile_context>

<pallas_src>
import functools

import jax
import jax.numpy as jnp
from jax import lax
from jax.experimental import pallas as pl
from jax.experimental.pallas import tpu as pltpu


def _round_up(x, m):
    return (x + m - 1) // m * m


def _cdiv(a, b):
    return -(-a // b)


# ----------------------------- Pallas kernel --------------------------------
def _conv_tile_kernel(x_ref, wa_ref, wb_ref, wc_ref, wd_ref, we_ref, shift_ref,
                      out_ref, *, tile_oh, wo, wp_pad, c_in, c_out_pad):
    """TILE_OH output rows of conv3x3(stride 2) + fused (bias+BN) shift + ReLU.

    x_ref block: (1, TILE_OH+1, Wp_pad, 4*C_in) bf16, channel order
    [phase00, phase01, phase10, phase11] where phase(p,q)[i,j] = x[2i+p, 2j+q].

    Tap (kh, kw) of the 3x3 kernel reads phase (kh%2, kw%2) at offset
    (kh//2, kw//2).  Grouping taps by that (row, col) offset gives four shift
    groups; each group is one (or two) MXU dots over the whole flattened block:
        a00 (dh=0, dw=0): taps (0,0),(0,1),(1,0),(1,1)  -> K = 4*C_in
        a10 (dh=1, dw=0): taps (2,0),(2,1)              -> K = 2*C_in
        a01 (dh=0, dw=1): taps (0,2),(1,2)              -> K = C_in + C_in
        a11 (dh=1, dw=1): tap  (2,2)                    -> K = C_in
    out[r, c] = a00[r, c] + a01[r, c+1] + a10[r+1, c] + a11[r+1, c+1] + shift.
    """
    c = c_in
    t1 = tile_oh + 1
    f32 = jnp.float32

    # (M, 4C) bf16; Wp_pad is a multiple of 8 so this reshape is layout-trivial.
    x = x_ref[0].reshape(t1 * wp_pad, 4 * c)

    a00 = jnp.dot(x, wa_ref[...], preferred_element_type=f32)               # K = 4C
    a10 = jnp.dot(x[:, 0:2 * c], wb_ref[...], preferred_element_type=f32)   # K = 2C
    a01 = (jnp.dot(x[:, 0:c], wc_ref[...], preferred_element_type=f32)      # phase00
           + jnp.dot(x[:, 2 * c:3 * c], wd_ref[...],
                     preferred_element_type=f32))                           # phase10
    a11 = jnp.dot(x[:, 0:c], we_ref[...], preferred_element_type=f32)       # K = C

    a00 = a00.reshape(t1, wp_pad, c_out_pad)
    a01 = a01.reshape(t1, wp_pad, c_out_pad)
    a10 = a10.reshape(t1, wp_pad, c_out_pad)
    a11 = a11.reshape(t1, wp_pad, c_out_pad)

    y = (a00[0:tile_oh, 0:wo]
         + a01[0:tile_oh, 1:wo + 1]
         + a10[1:t1, 0:wo]
         + a11[1:t1, 1:wo + 1]
         + shift_ref[...])                       # (1, 1, Cpad) broadcast, f32
    out_ref[0] = jnp.maximum(y, 0.0).astype(out_ref.dtype)   # ReLU, bf16 store


def _pick_tile_oh(ho, wp_pad, c4, c_out_pad):
    """Aim for M = (TILE+1)*Wp_pad of a few hundred rows (fills the 128/256-row
    MXU) while keeping the per-step working set well under the smallest scoped
    VMEM budget (v7x: 64 MiB physical / 32 MiB default-scoped)."""
    tile = min(ho, max(1, _cdiv(512, wp_pad)))

    def step_bytes(t):
        x_in = 2 * (t + 1) * wp_pad * c4 * 2            # double-buffered bf16 input block
        acc = 4 * (t + 1) * wp_pad * c_out_pad * 4      # f32 shift-group accumulators
        out = 2 * t * wp_pad * c_out_pad * 2            # double-buffered bf16 output block
        return x_in + acc + out

    budget = 12 * 1024 * 1024
    while tile > 1 and step_bytes(tile) > budget:
        tile -= 1
    return tile


# ------------------------------- JAX glue ------------------------------------
def unet_conv2_forward(x, params, eps=1e-5, tile_oh=None):
    """x: (N, C_in, H, W) float32 NCHW. Returns (N, C_out, Ho, Wo) float32 NCHW.

    NCHW/f32 is kept at this public boundary only to match the PyTorch module.
    """
    w, b = params["w"], params["b"]
    gamma, beta = params["gamma"], params["beta"]
    run_mean, run_var = params["running_mean"], params["running_var"]

    N, C_in, H, W = x.shape
    C_out = w.shape[0]
    assert H >= 3 and W >= 3, "3x3 VALID conv needs H, W >= 3"
    Ho = (H - 3) // 2 + 1
    Wo = (W - 3) // 2 + 1
    C_pad = _round_up(C_out, 128)            # lane-dense matmul N dim / stores
    c4 = 4 * C_in
    Wp_pad = _round_up(Wo + 1, 8)            # sublane-dense column window

    # ---- fold eval-mode BatchNorm + conv bias into weights / one shift ------
    #   y = gamma * (conv(x, w) + b - mean) / sqrt(var + eps) + beta
    #     = conv(x, w * scale) + shift
    scale = gamma / jnp.sqrt(run_var + eps)                      # (C_out,)
    shift = (b - run_mean) * scale + beta                        # (C_out,)
    w_eff = w * scale[:, None, None, None]                       # (C_out, C_in, 3, 3)

    def tap(kh, kw):  # (C_in, C_pad) bf16 weight matrix for one 3x3 tap
        t = jnp.transpose(w_eff[:, :, kh, kw], (1, 0))           # (C_in, C_out)
        return jnp.pad(t, ((0, 0), (0, C_pad - C_out))).astype(jnp.bfloat16)

    # Shift-group weights (channel order inside a group = phase order 00,01,10,11).
    w_a = jnp.concatenate([tap(0, 0), tap(0, 1), tap(1, 0), tap(1, 1)], axis=0)  # (4C, Cpad)
    w_b = jnp.concatenate([tap(2, 0), tap(2, 1)], axis=0)                        # (2C, Cpad)
    w_c = tap(0, 2)                                                              # (C,  Cpad)
    w_d = tap(1, 2)                                                              # (C,  Cpad)
    w_e = tap(2, 2)                                                              # (C,  Cpad)
    shift_pad = jnp.pad(shift, (0, C_pad - C_out)).reshape(1, 1, C_pad).astype(jnp.float32)

    # ---- row-tile size / grid ------------------------------------------------
    if tile_oh is None:
        tile_oh = _pick_tile_oh(Ho, Wp_pad, c4, C_pad)
    n_tiles = _cdiv(Ho, tile_oh)
    Hp_pad = n_tiles * tile_oh + 1

    # ---- phase-stacked NHWC bf16 input, zero-padded, pre-tiled row blocks ----
    # xs[n, i, j, p*2C_in + q*C_in + c] = x[n, c, 2i+p, 2j+q]; padded rows/cols
    # only ever feed output rows/cols that are sliced off below.
    xb = jnp.transpose(x, (0, 2, 3, 1)).astype(jnp.bfloat16)     # (N, H, W, C_in)

    def phase(p, q):
        xp = xb[:, p::2, q::2, :]
        return jnp.pad(xp, ((0, 0), (0, Hp_pad - xp.shape[1]),
                            (0, Wp_pad - xp.shape[2]), (0, 0)))

    xs = jnp.concatenate([phase(0, 0), phase(0, 1), phase(1, 0), phase(1, 1)],
                         axis=-1)                                # (N, Hp_pad, Wp_pad, 4C)

    # Overlapping (TILE_OH+1)-row windows: main rows via reshape + 1 halo row per
    # tile (~1/TILE_OH extra HBM bytes instead of the previous 2x duplication).
    main = xs[:, :n_tiles * tile_oh].reshape(N, n_tiles, tile_oh, Wp_pad, c4)
    halo = xs[:, tile_oh::tile_oh]                               # (N, n_tiles, Wp_pad, 4C)
    assert halo.shape[1] == n_tiles
    x_tiles = jnp.concatenate([main, halo[:, :, None]], axis=2)  # (N, n_tiles, T+1, Wp, 4C)
    x_tiles = x_tiles.reshape(N * n_tiles, tile_oh + 1, Wp_pad, c4)

    kernel = functools.partial(_conv_tile_kernel, tile_oh=tile_oh, wo=Wo,
                               wp_pad=Wp_pad, c_in=C_in, c_out_pad=C_pad)

    out_raw = pl.pallas_call(
        kernel,
        grid=(N * n_tiles,),
        in_specs=[
            pl.BlockSpec((1, tile_oh + 1, Wp_pad, c4), lambda g: (g, 0, 0, 0)),
            pl.BlockSpec((4 * C_in, C_pad), lambda g: (0, 0)),   # weights, grid-invariant
            pl.BlockSpec((2 * C_in, C_pad), lambda g: (0, 0)),
            pl.BlockSpec((C_in, C_pad), lambda g: (0, 0)),
            pl.BlockSpec((C_in, C_pad), lambda g: (0, 0)),
            pl.BlockSpec((C_in, C_pad), lambda g: (0, 0)),
            pl.BlockSpec((1, 1, C_pad), lambda g: (0, 0, 0)),    # fused bias+BN shift
        ],
        out_specs=pl.BlockSpec((1, tile_oh, Wo, C_pad), lambda g: (g, 0, 0, 0)),
        out_shape=jax.ShapeDtypeStruct((N * n_tiles, tile_oh, Wo, C_pad), jnp.bfloat16),
        compiler_params=pltpu.CompilerParams(
            dimension_semantics=("parallel",)),   # independent steps (megacore on v7x)
    )(x_tiles, w_a, w_b, w_c, w_d, w_e, shift_pad)

    # Strip row/channel padding; back to NCHW f32 at the module boundary only.
    out = out_raw.reshape(N, n_tiles * tile_oh, Wo, C_pad)[:, :Ho, :, :C_out]
    return jnp.transpose(out.astype(jnp.float32), (0, 3, 1, 2))


# ------------------------------ references -----------------------------------
def _conv_bn_relu_ref(x, w_eff, shift):
    y = lax.conv_general_dilated(
        x, w_eff, window_strides=(2, 2), padding="VALID",
        dimension_numbers=("NCHW", "OIHW", "NCHW"),
        precision=lax.Precision.HIGHEST)
    return jnp.maximum(y + shift.reshape(1, -1, 1, 1), 0.0)


def _reference_f32(x, params, eps=1e-5):
    scale = params["gamma"] / jnp.sqrt(params["running_var"] + eps)
    shift = (params["b"] - params["running_mean"]) * scale + params["beta"]
    w_eff = params["w"] * scale[:, None, None, None]
    return _conv_bn_relu_ref(x, w_eff, shift)


def _reference_bf16_matched(x, params, eps=1e-5):
    # Same bf16 rounding of matmul inputs and of the stored output as the kernel,
    # with f32 accumulation in between.
    scale = params["gamma"] / jnp.sqrt(params["running_var"] + eps)
    shift = (params["b"] - params["running_mean"]) * scale + params["beta"]
    w_eff = (params["w"] * scale[:, None, None, None]
             ).astype(jnp.bfloat16).astype(jnp.float32)
    xr = x.astype(jnp.bfloat16).astype(jnp.float32)
    y = _conv_bn_relu_ref(xr, w_eff, shift)
    return y.astype(jnp.bfloat16).astype(jnp.float32)


# -------------------------------- main ----------------------------------------
if __name__ == "__main__":
    key = jax.random.PRNGKey(0)
    N, C_in, H, W = 2, 4, 16, 16
    C_out = 8

    k_x, k_w, k_b, k_g, k_be, k_m, k_v = jax.random.split(key, 7)
    x = jax.random.normal(k_x, (N, C_in, H, W), dtype=jnp.float32)
    params = {
        "w": jax.random.normal(k_w, (C_out, C_in, 3, 3), dtype=jnp.float32) * 0.1,
        "b": jax.random.normal(k_b, (C_out,), dtype=jnp.float32) * 0.1,
        "gamma": 1.0 + 0.1 * jax.random.normal(k_g, (C_out,), dtype=jnp.float32),
        "beta": 0.1 * jax.random.normal(k_be, (C_out,), dtype=jnp.float32),
        "running_mean": 0.1 * jax.random.normal(k_m, (C_out,), dtype=jnp.float32),
        "running_var": 1.0 + 0.1 * jnp.abs(
            jax.random.normal(k_v, (C_out,), dtype=jnp.float32)),
    }

    fwd = jax.jit(unet_conv2_forward)
    out = jax.block_until_ready(fwd(x, params))

    assert out.shape == (N, C_out, 7, 7), out.shape

    # Tight check vs. a reference applying the same bf16 in/out rounding.
    ref_matched = _reference_bf16_matched(x, params)
    assert jnp.allclose(out, ref_matched, atol=3e-2, rtol=3e-2), \
        "mismatch vs bf16-matched reference"

    # Loose check vs. the full-f32 reference (bounds bf16 quantisation error).
    ref_f32 = _reference_f32(x, params)
    assert jnp.allclose(out, ref_f32, atol=8e-2, rtol=8e-2), \
        "mismatch vs f32 reference"

    print("KERNEL_OK")
</pallas_src>

<mosaic_0001>
module attributes {stable_mosaic.version = 11 : i64} {
  func.func @_conv_tile_kernel(%arg0: i32, %arg1: memref<1x8x8x16xbf16, #tpu.memory_space<vmem>>, %arg2: memref<16x128xbf16, #tpu.memory_space<vmem>>, %arg3: memref<8x128xbf16, #tpu.memory_space<vmem>>, %arg4: memref<4x128xbf16, #tpu.memory_space<vmem>>, %arg5: memref<4x128xbf16, #tpu.memory_space<vmem>>, %arg6: memref<4x128xbf16, #tpu.memory_space<vmem>>, %arg7: memref<1x1x128xf32, #tpu.memory_space<vmem>>, %arg8: memref<1x7x7x128xbf16, #tpu.memory_space<vmem>>) attributes {dimension_semantics = [#tpu.dimension_semantics<parallel>], iteration_bounds = array<i64: 2>, scalar_prefetch = 0 : i64, scratch_operands = 0 : i64, tpu.core_type = #tpu.core_type<tc>, window_params = [{transform_indices = @transform_0, window_bounds = array<i64: 1, 8, 8, 16>}, {pipeline_mode = #tpu.pipeline_mode<synchronous>, transform_indices = @transform_1, window_bounds = array<i64: 16, 128>}, {pipeline_mode = #tpu.pipeline_mode<synchronous>, transform_indices = @transform_2, window_bounds = array<i64: 8, 128>}, {pipeline_mode = #tpu.pipeline_mode<synchronous>, transform_indices = @transform_3, window_bounds = array<i64: 4, 128>}, {pipeline_mode = #tpu.pipeline_mode<synchronous>, transform_indices = @transform_4, window_bounds = array<i64: 4, 128>}, {pipeline_mode = #tpu.pipeline_mode<synchronous>, transform_indices = @transform_5, window_bounds = array<i64: 4, 128>}, {pipeline_mode = #tpu.pipeline_mode<synchronous>, transform_indices = @transform_6, window_bounds = array<i64: 1, 1, 128>}, {transform_indices = @transform_7, window_bounds = array<i64: 1, 7, 7, 128>}]} {
    %c0 = arith.constant 0 : index
    %c0_0 = arith.constant 0 : index
    %c0_1 = arith.constant 0 : index
    %c0_2 = arith.constant 0 : index
    %0 = vector.load %arg1[%c0, %c0_0, %c0_1, %c0_2] : memref<1x8x8x16xbf16, #tpu.memory_space<vmem>>, vector<1x8x8x16xbf16>
    %1 = vector.shape_cast %0 : vector<1x8x8x16xbf16> to vector<8x8x16xbf16>
    %2 = vector.shape_cast %1 : vector<8x8x16xbf16> to vector<64x16xbf16>
    %c0_3 = arith.constant 0 : index
    %c0_4 = arith.constant 0 : index
    %3 = vector.load %arg2[%c0_3, %c0_4] : memref<16x128xbf16, #tpu.memory_space<vmem>>, vector<16x128xbf16>
    %cst = arith.constant dense<0.000000e+00> : vector<64x128xf32>
    %4 = tpu.matmul %2, %3, %cst {dimension_numbers = #tpu.dot_dimension_numbers<[1], [0], [0], [1], [0, 0, 1, 1], [], []>} : vector<64x16xbf16>, vector<16x128xbf16>, vector<64x128xf32> -> vector<64x128xf32>
    %5 = vector.extract_strided_slice %2 {offsets = [0, 0], sizes = [64, 8], strides = [1, 1]} : vector<64x16xbf16> to vector<64x8xbf16>
    %c0_5 = arith.constant 0 : index
    %c0_6 = arith.constant 0 : index
    %6 = vector.load %arg3[%c0_5, %c0_6] : memref<8x128xbf16, #tpu.memory_space<vmem>>, vector<8x128xbf16>
    %cst_7 = arith.constant dense<0.000000e+00> : vector<64x128xf32>
    %7 = tpu.matmul %5, %6, %cst_7 {dimension_numbers = #tpu.dot_dimension_numbers<[1], [0], [0], [1], [0, 0, 1, 1], [], []>} : vector<64x8xbf16>, vector<8x128xbf16>, vector<64x128xf32> -> vector<64x128xf32>
    %8 = vector.extract_strided_slice %2 {offsets = [0, 0], sizes = [64, 4], strides = [1, 1]} : vector<64x16xbf16> to vector<64x4xbf16>
    %c0_8 = arith.constant 0 : index
    %c0_9 = arith.constant 0 : index
    %9 = vector.load %arg4[%c0_8, %c0_9] : memref<4x128xbf16, #tpu.memory_space<vmem>>, vector<4x128xbf16>
    %cst_10 = arith.constant dense<0.000000e+00> : vector<64x128xf32>
    %10 = tpu.matmul %8, %9, %cst_10 {dimension_numbers = #tpu.dot_dimension_numbers<[1], [0], [0], [1], [0, 0, 1, 1], [], []>} : vector<64x4xbf16>, vector<4x128xbf16>, vector<64x128xf32> -> vector<64x128xf32>
    %11 = vector.extract_strided_slice %2 {offsets = [0, 8], sizes = [64, 4], strides = [1, 1]} : vector<64x16xbf16> to vector<64x4xbf16>
    %c0_11 = arith.constant 0 : index
    %c0_12 = arith.constant 0 : index
    %12 = vector.load %arg5[%c0_11, %c0_12] : memref<4x128xbf16, #tpu.memory_space<vmem>>, vector<4x128xbf16>
    %cst_13 = arith.constant dense<0.000000e+00> : vector<64x128xf32>
    %13 = tpu.matmul %11, %12, %cst_13 {dimension_numbers = #tpu.dot_dimension_numbers<[1], [0], [0], [1], [0, 0, 1, 1], [], []>} : vector<64x4xbf16>, vector<4x128xbf16>, vector<64x128xf32> -> vector<64x128xf32>
    %14 = arith.addf %10, %13 : vector<64x128xf32>
    %15 = vector.extract_strided_slice %2 {offsets = [0, 0], sizes = [64, 4], strides = [1, 1]} : vector<64x16xbf16> to vector<64x4xbf16>
    %c0_14 = arith.constant 0 : index
    %c0_15 = arith.constant 0 : index
    %16 = vector.load %arg6[%c0_14, %c0_15] : memref<4x128xbf16, #tpu.memory_space<vmem>>, vector<4x128xbf16>
    %cst_16 = arith.constant dense<0.000000e+00> : vector<64x128xf32>
    %17 = tpu.matmul %15, %16, %cst_16 {dimension_numbers = #tpu.dot_dimension_numbers<[1], [0], [0], [1], [0, 0, 1, 1], [], []>} : vector<64x4xbf16>, vector<4x128xbf16>, vector<64x128xf32> -> vector<64x128xf32>
    %18 = vector.shape_cast %4 : vector<64x128xf32> to vector<8x8x128xf32>
    %19 = vector.shape_cast %14 : vector<64x128xf32> to vector<8x8x128xf32>
    %20 = vector.shape_cast %7 : vector<64x128xf32> to vector<8x8x128xf32>
    %21 = vector.shape_cast %17 : vector<64x128xf32> to vector<8x8x128xf32>
    %22 = vector.extract_strided_slice %18 {offsets = [0, 0, 0], sizes = [7, 7, 128], strides = [1, 1, 1]} : vector<8x8x128xf32> to vector<7x7x128xf32>
    %23 = vector.extract_strided_slice %19 {offsets = [0, 1, 0], sizes = [7, 7, 128], strides = [1, 1, 1]} : vector<8x8x128xf32> to vector<7x7x128xf32>
    %24 = arith.addf %22, %23 : vector<7x7x128xf32>
    %25 = vector.extract_strided_slice %20 {offsets = [1, 0, 0], sizes = [7, 7, 128], strides = [1, 1, 1]} : vector<8x8x128xf32> to vector<7x7x128xf32>
    %26 = arith.addf %24, %25 : vector<7x7x128xf32>
    %27 = vector.extract_strided_slice %21 {offsets = [1, 1, 0], sizes = [7, 7, 128], strides = [1, 1, 1]} : vector<8x8x128xf32> to vector<7x7x128xf32>
    %28 = arith.addf %26, %27 : vector<7x7x128xf32>
    %c0_17 = arith.constant 0 : index
    %c0_18 = arith.constant 0 : index
    %c0_19 = arith.constant 0 : index
    %29 = vector.load %arg7[%c0_17, %c0_18, %c0_19] : memref<1x1x128xf32, #tpu.memory_space<vmem>>, vector<1x1x128xf32>
    %30 = vector.broadcast %29 : vector<1x1x128xf32> to vector<7x7x128xf32>
    %31 = arith.addf %28, %30 : vector<7x7x128xf32>
    %cst_20 = arith.constant 0.000000e+00 : f32
    %32 = vector.broadcast %cst_20 : f32 to vector<7x7x128xf32>
    %33 = arith.maximumf %31, %32 : vector<7x7x128xf32>
    %34 = arith.truncf %33 : vector<7x7x128xf32> to vector<7x7x128xbf16>
    %c0_21 = arith.constant 0 : index
    %c0_22 = arith.constant 0 : index
    %c0_23 = arith.constant 0 : index
    %c0_24 = arith.constant 0 : index
    %35 = vector.load %arg8[%c0_21, %c0_22, %c0_23, %c0_24] : memref<1x7x7x128xbf16, #tpu.memory_space<vmem>>, vector<1x7x7x128xbf16>
    %36 = vector.shape_cast %35 : vector<1x7x7x128xbf16> to vector<7x7x128xbf16>
    %37 = vector.shape_cast %34 : vector<7x7x128xbf16> to vector<1x7x7x128xbf16>
    tpu.vector_store %arg8[%c0_21, %c0_22, %c0_23, %c0_24], %37 {strides = array<i32>} : memref<1x7x7x128xbf16, #tpu.memory_space<vmem>>, vector<1x7x7x128xbf16>,
    return
  }
  func.func @transform_0(%arg0: i32) -> (i32, i32, i32, i32) {
    %c0_i32 = arith.constant 0 : i32
    %c0_i32_0 = arith.constant 0 : i32
    %c0_i32_1 = arith.constant 0 : i32
    %c0_i32_2 = arith.constant 0 : i32
    return %arg0, %c0_i32, %c0_i32_0, %c0_i32_1 : i32, i32, i32, i32
  }
  func.func @transform_1(%arg0: i32) -> (i32, i32) {
    %c0_i32 = arith.constant 0 : i32
    %c0_i32_0 = arith.constant 0 : i32
    %c0_i32_1 = arith.constant 0 : i32
    return %c0_i32, %c0_i32_0 : i32, i32
  }
  func.func @transform_2(%arg0: i32) -> (i32, i32) {
    %c0_i32 = arith.constant 0 : i32
    %c0_i32_0 = arith.constant 0 : i32
    %c0_i32_1 = arith.constant 0 : i32
    return %c0_i32, %c0_i32_0 : i32, i32
  }
  func.func @transform_3(%arg0: i32) -> (i32, i32) {
    %c0_i32 = arith.constant 0 : i32
    %c0_i32_0 = arith.constant 0 : i32
    %c0_i32_1 = arith.constant 0 : i32
    return %c0_i32, %c0_i32_0 : i32, i32
  }
  func.func @transform_4(%arg0: i32) -> (i32, i32) {
    %c0_i32 = arith.constant 0 : i32
    %c0_i32_0 = arith.constant 0 : i32
    %c0_i32_1 = arith.constant 0 : i32
    return %c0_i32, %c0_i32_0 : i32, i32
  }
  func.func @transform_5(%arg0: i32) -> (i32, i32) {
    %c0_i32 = arith.constant 0 : i32
    %c0_i32_0 = arith.constant 0 : i32
    %c0_i32_1 = arith.constant 0 : i32
    return %c0_i32, %c0_i32_0 : i32, i32
  }
  func.func @transform_6(%arg0: i32) -> (i32, i32, i32) {
    %c0_i32 = arith.constant 0 : i32
    %c0_i32_0 = arith.constant 0 : i32
    %c0_i32_1 = arith.constant 0 : i32
    %c0_i32_2 = arith.constant 0 : i32
    return %c0_i32, %c0_i32_0, %c0_i32_1 : i32, i32, i32
  }
  func.func @transform_7(%arg0: i32) -> (i32, i32, i32, i32) {
    %c0_i32 = arith.constant 0 : i32
    %c0_i32_0 = arith.constant 0 : i32
    %c0_i32_1 = arith.constant 0 : i32
    %c0_i32_2 = arith.constant 0 : i32
    return %arg0, %c0_i32, %c0_i32_0, %c0_i32_1 : i32, i32, i32, i32
  }
}

</mosaic_0001>

<bundles_post_ra>
// kernel: unet_conv2_forward.1
= control target key start
LH: loop header
LB: loop body
LE: loop exit
PB: predicated region body
PF: predicated region fallthrough
CT: control target
= control target key end

     0   :  { %s1065_s24 = smov 0   ;;  %s1185_s0 = inlined_call_operand.vmem [shape: bf16[2,8,8,16], index: 0, kind: input, shape index: {}]   ;;  %s1186_s1 = inlined_call_operand.vmem [shape: bf16[16,128], index: 1, kind: input, shape index: {}]   ;;  %s1187_s2 = inlined_call_operand.vmem [shape: bf16[8,128], index: 2, kind: input, shape index: {}]   ;;  %s1188_s3 = inlined_call_operand.vmem [shape: bf16[4,128], index: 3, kind: input, shape index: {}]   ;;  %s1189_s4 = inlined_call_operand.vmem [shape: bf16[4,128], index: 4, kind: input, shape index: {}]   ;;  %s1190_s5 = inlined_call_operand.vmem [shape: bf16[4,128], index: 5, kind: input, shape index: {}]   ;;  %s1191_s6 = inlined_call_operand.vmem [shape: f32[1,1,128], index: 6, kind: input, shape index: {}]   ;;  %s1192_s7 = inlined_call_operand.vmem [shape: bf16[2,7,7,128], index: 7, kind: output, shape index: {}]  }
   0x1 LB: > { %s875_s25 = sadd.s32 4294967295, %s1022_s24   ;;  %p879_p0 = scmp.ge.s32.totalorder %s1022_s24, 1  ;;  %s1022_s24 = sphi %s1065_s24, %s17_s24  }
   0x2   : > { %p237_p1 = scmp.lt.s32.totalorder %s1022_s24, 3 }
   0x4   : > { %p238_p2 = pnand %p879_p0, %p237_p1 }
   0x5   : > { %p269_p3 = scmp.lt.s32.totalorder (!%p238_p2), %s875_s25, 1  ;;  %v1015_v0 = vld [vmem:[%s1186_s1] sm:$0xff] (!%p238_p2)   ;;  %vm494_vm0 = vcmask (!%p238_p2), 1041408   ;;  %vm403_vm1 = vcmask (!%p238_p2), 1043456   ;;  %vm316_vm2 = vcmask (!%p238_p2), 130048   ;;  %s1024_s15 = smov (!%p238_p2), 120  }
   0x6   : > { %241 = sbr.rel (%p238_p2) target bundleno = 391 (0x187), region = 48  ;;  %v472_v1 = vld [vmem:[%s1189_s4] sm:$0x3] (!%p238_p2)  ;;  %937 = vmatprep.subr.bf16.mxu0 (!%p238_p2), %v1015_v0  ;;  %987 = vmatprep.subr.bf16.mxu1 (!%p238_p2), %v1015_v0  ;;  %vm394_vm3 = vcmask (!%p238_p2), 64512   ;;  %vm481_vm4 = vcmask (!%p238_p2), 31744  }
   0x7   : > { %v393_v2 = vld [vmem:[%s1187_s2] sm:$0xf] (!%p238_p2)  ;;  %938 = vmatpush3.bf16.msra.mxu0 (!%p238_p2), %v1015_v0  ;;  %988 = vmatpush3.bf16.msra.mxu1 (!%p238_p2), %v1015_v0  ;;  %v496_v8 = vsel (!%p238_p2), %vm494_vm0, %v472_v1, 0  ;;  %vm797_vm5 = vsmask.f32 (!%p238_p2), 3328 }
   0x8   : > { %v471_v3 = vld [vmem:[%s1188_s3] sm:$0x3] (!%p238_p2)  ;;  %998 = vmatprep.subr.msk.bf16.mxu0 (!%p238_p2), %vm494_vm0, %v472_v1  ;;  %997 = vmatprep.subr.msk.bf16.mxu1 (!%p238_p2), %vm403_vm1, %v393_v2  ;;  %v405_v10 = vsel (!%p238_p2), %vm403_vm1, %v393_v2, 0  ;;  %vm1145_vm6 = vmand (!%p238_p2), %vm403_vm1, %vm797_vm5 }
   0x9   : > { %v571_v4 = vsel (!%p238_p2), %vm494_vm0, %v471_v3, 0  ;;  %v637_v11 = vld [vmem:[%s1190_s5] sm:$0x3] (!%p238_p2) }
   0xa   : > { %v639_v12 = vsel (!%p238_p2), %vm494_vm0, %v637_v11, 0  ;;  %v908_v57 = vld [vmem:[%s1191_s6] ss:$0 sm:$0xff] (!%p238_p2) }
   0xd   : > { %s1196_s25 = smov (!%p269_p3, %s875_s25), 1 }
   0xe   : > { %s911_s11 = sshll.u32 %s1196_s25, 5  ;;  %s1001_s18 = smul.u32 28, %s1196_s25 }
   0xf   : > { %s273_s14 = scalar_lea.vmem %s1185_s0, %s911_s11 }
  0x10   : > { %v1011_v5 = vld [vmem:[%s273_s14] sm:$0xff]   ;;  %v1012_v6 = vld [vmem:[%s273_s14 + $0x8] sm:$0xff]   ;;  %v1013_v7 = vld [vmem:[%s273_s14 + $0x10] sm:$0xff]   ;;  %s1139_s23 = scalar_lea.vmem %s1192_s7, %s1001_s18 }
  0x11   : > { %473 = vrot.lane.b32.xlu0 %v1011_v5, %s1024_s15  ;;  %939 = vmatprep.mubr.msk.bf16.mxu0 %vm316_vm2, %v1011_v5  ;;  %v1014_v9 = vld [vmem:[%s273_s14 + $0x18] sm:$0xff]  }
  0x12   : > { %940 = vmatmul.mubr.msk.bf16.vlgmr.msra.gmra.mrb[0].mxu0 %vm316_vm2, %v1012_v6  ;;  %477 = vrot.lane.b32.xlu1 %v1013_v7, %s1024_s15 }
  0x13   : > { %943 = vmatprep.mubr.msk.bf16.mxu1 %vm316_vm2, %v1013_v7  ;;  %958 = vmatpush3.bf16.msra.mxu0 %v496_v8 }
  0x14   : > { %944 = vmatmul.mubr.msk.bf16.vlgmr.msra.gmra.mrb[0].mxu1 %vm316_vm2, %v1014_v9  ;;  %999 = vmatprep.subr.msk.bf16.mxu0 %vm494_vm0, %v471_v3 }
  0x15   : > { %475 = vrot.lane.b32.xlu0 %v1012_v6, %s1024_s15  ;;  %948 = vmatpush3.bf16.msra.mxu1 %v405_v10 }
  0x16   : > { %949 = vmatprep.mubr.msk.bf16.mxu1 %vm394_vm3, %v1011_v5  ;;  %479 = vrot.lane.b32.xlu1 %v1014_v9, %s1024_s15 }
  0x17   : > { %1000 = vmatprep.subr.msk.bf16.mxu1 %vm494_vm0, %v637_v11 }
  0x1c   : > { %950 = vmatmul.mubr.msk.bf16.vlgmr.msra.gmra.mrb[4].mxu1 %vm394_vm3, %v1012_v6 }
  0x1d   : > { %953 = vmatprep.mubr.msk.bf16.mxu1 %vm394_vm3, %v1013_v7  ;;  %978 = vmatpush3.bf16.msra.mxu1 %v639_v12 }
  0x24   : > { %954 = vmatmul.mubr.msk.bf16.gmra.mrb[8].mxu1 %vm394_vm3, %v1014_v9 }
  0x25   : > { %979 = vmatprep.mubr.msk.bf16.mxu1 %vm481_vm4, %v1011_v5 }
  0x2c   : > { %980 = vmatmul.mubr.msk.bf16.vlgmr.msra.gmra.mrb[12].mxu1 %vm481_vm4, %v1012_v6 }
  0x2d   : > { %983 = vmatprep.mubr.msk.bf16.mxu1 %vm481_vm4, %v1013_v7 }
  0x34   : > { %984 = vmatmul.mubr.msk.bf16.gmra.mrb[16].mxu1 %vm481_vm4, %v1014_v9 }
  0x83   : > { %v474_v13 = vpop.permute.xlu0 %473 }
  0x84   : > { %959 = vmatprep.mubr.msk.bf16.mxu0 %vm481_vm4, %v474_v13  ;;  %v478_v14 = vpop.permute.xlu1 %477 }
  0x87   : > { %v476_v15 = vpop.permute.xlu0 %475 }
  0x88   : > { %960 = vmatmul.mubr.msk.bf16.vlgmr.msra.gmra.mrb[4].mxu0 %vm481_vm4, %v476_v15  ;;  %v480_v16 = vpop.permute.xlu1 %479 }
  0x89   : > { %968 = vmatpush3.bf16.msra.mxu0 %v571_v4  ;;  %963 = vmatprep.mubr.msk.bf16.mxu0 %vm481_vm4, %v478_v14 }
  0x90   : > { %964 = vmatmul.mubr.msk.bf16.gmra.mrb[8].mxu0 %vm481_vm4, %v480_v16 }
  0x91   : > { %969 = vmatprep.mubr.msk.bf16.mxu0 %vm481_vm4, %v1011_v5 }
  0x98   : > { %970 = vmatmul.mubr.msk.bf16.vlgmr.msra.gmra.mrb[4].mxu0 %vm481_vm4, %v1012_v6 }
  0x99   : > { %973 = vmatprep.mubr.msk.bf16.mxu0 %vm481_vm4, %v1013_v7 }
  0xa0   : > { %974 = vmatmul.mubr.msk.bf16.gmra.mrb[8].mxu0 %vm481_vm4, %v1014_v9 }
  0xe5   : > { %v941_v17 = vpop.f32.mrb[0].mxu0 }
  0xe6   : > { %v363_v18 = vpop.f32.mrb[1].mxu0 }
  0xe7   : > { %v942_v19 = vpop.f32.mrb[2].mxu0  ;;  %v945_v20 = vpop.f32.mrb[0].mxu1 }
  0xe8   : > { %v366_v21 = vpop.f32.mrb[3].mxu0  ;;  %v1118_v22 = vpop.f32.mrb[1].mxu1 }
  0xe9   : > { %v946_v23 = vpop.f32.mrb[2].mxu1 }
  0xea   : > { %v1120_v24 = vpop.f32.mrb[3].mxu1 }
  0xef   : > { %v951_v25 = vpop.f32.mrb[4].mxu1 }
  0xf0   : > { %v441_v26 = vpop.f32.mrb[5].mxu1 }
  0xf1   : > { %v952_v27 = vpop.f32.mrb[6].mxu1 }
  0xf2   : > { %v443_v28 = vpop.f32.mrb[7].mxu1 }
  0xf7   : > { %v1122_v29 = vpop.f32.mrb[8].mxu1 }
  0xf8   : > { %v456_v30 = vpop.f32.mrb[9].mxu1 }
  0xf9   : > { %v956_v31 = vpop.f32.mrb[10].mxu1 }
  0xfa   : > { %v1124_v32 = vpop.f32.mrb[11].mxu1 }
  0xff   : > { %v981_v33 = vpop.f32.mrb[12].mxu1 }
 0x100   : > { %v675_v34 = vpop.f32.mrb[13].mxu1  ;;  %v748_v61 = vrot.slane %v981_v33, 1 }
 0x101   : > { %v982_v35 = vpop.f32.mrb[14].mxu1 }
 0x102   : > { %v677_v36 = vpop.f32.mrb[15].mxu1  ;;  %v749_v49 = vrot.slane %v982_v35, 1  ;;  %v802_v35 = vld [vmem:[%s1139_s23 + $0x4] sm:$0xf] }
 0x103   : > { %v747_v52 = vrot.slane %v677_v36, 1 }
 0x107   : > { %v1126_v37 = vpop.f32.mrb[16].mxu1 }
 0x108   : > { %v690_v38 = vpop.f32.mrb[17].mxu1 }
 0x109   : > { %v1128_v39 = vpop.f32.mrb[18].mxu1  ;;  %v750_v55 = vrot.slane %v690_v38, 1 }
 0x10a   : > { %v1130_v40 = vpop.f32.mrb[19].mxu1  ;;  %v753_v9 = vrot.slane %v1128_v39, 1 }
 0x10b   : > { %v751_v14 = vrot.slane %v1130_v40, 1 }
 0x16b   : > { %v971_v41 = vpop.f32.mrb[4].mxu0 }
 0x16c   : > { %v714_v42 = vrot.slane %v971_v41, 1  ;;  %v607_v43 = vpop.f32.mrb[5].mxu0 }
 0x16d   : > { %v712_v44 = vrot.slane %v607_v43, 1  ;;  %v972_v45 = vpop.f32.mrb[6].mxu0 }
 0x16e   : > { %v728_v46 = vadd.f32 %v941_v17, %v714_v42  ;;  %v715_v47 = vrot.slane %v972_v45, 1  ;;  %v610_v48 = vpop.f32.mrb[7].mxu0  ;;  %v805_v17 = vld [vmem:[%s1139_s23 + $0x8] sm:$0xf] }
 0x16f   : > { %v726_v50 = vadd.f32 %v712_v44, %v363_v18  ;;  %v713_v51 = vrot.slane %v610_v48, 1 }
 0x170   : > { %v729_v53 = vadd.f32 %v942_v19, %v715_v47  ;;  %v735_v54 = vadd.f32 %v952_v27, %v728_v46 }
 0x171   : > { %v727_v56 = vadd.f32 %v713_v51, %v366_v21  ;;  %v733_v58 = vadd.f32 %v726_v50, %v443_v28 }
 0x172   : > { %v763_v59 = vadd.f32 %v749_v49, %v735_v54  ;;  %v736_v60 = vadd.f32 %v729_v53, %v456_v30  ;;  %v808_v30 = vld [vmem:[%s1139_s23 + $0xc] sm:$0xf]  ;;  %v811_v49 = vld [vmem:[%s1139_s23 + $0x10] sm:$0xf] }
 0x173   : > { %v734_v62 = vadd.f32 %v951_v25, %v727_v56  ;;  %v761_v63 = vadd.f32 %v747_v52, %v733_v58  ;;  %v975_v0 = vpop.f32.mrb[8].mxu0  ;;  %v799_v25 = vld [vmem:[%s1139_s23] sm:$0xf]  ;;  %v814_v52 = vld [vmem:[%s1139_s23 + $0x14] sm:$0xf] }
 0x174   : > { %v777_v1 = vadd.f32 %v908_v57, %v763_v59  ;;  %v764_v2 = vadd.f32 %v750_v55, %v736_v60  ;;  %v718_v3 = vrot.slane %v975_v0, 1  ;;  %v623_v4 = vpop.f32.mrb[9].mxu0 }
 0x175   : > { %v762_v5 = vadd.f32 %v748_v61, %v734_v62  ;;  %v775_v6 = vadd.f32 %v908_v57, %v761_v63  ;;  %v716_v7 = vrot.slane %v623_v4, 1  ;;  %v976_v8 = vpop.f32.mrb[10].mxu0 }
 0x176   : > { %v784_v10 = vmax.f32 %v777_v1, 0.0  ;;  %v778_v11 = vadd.f32 %v908_v57, %v764_v2  ;;  %v732_v12 = vadd.f32 %v945_v20, %v718_v3  ;;  %v626_v13 = vpop.f32.mrb[11].mxu0 }
 0x177   : > { %v776_v16 = vadd.f32 %v908_v57, %v762_v5  ;;  %v782_v18 = vmax.f32 %v775_v6, 0.0  ;;  %v730_v19 = vadd.f32 %v716_v7, %v1118_v22  ;;  %v717_v21 = vrot.slane %v626_v13, 1 }
 0x178   : > { %v791_v23 = vpack.c.bf16 %v784_v10, %v784_v10  ;;  %v785_v20 = vmax.f32 %v778_v11, 0.0  ;;  %v739_v26 = vadd.f32 %v956_v31, %v732_v12  ;;  %v752_v22 = vrot.slane %v1126_v37, 1 }
 0x179   : > { %v783_v27 = vmax.f32 %v776_v16, 0.0  ;;  %v789_v28 = vpack.c.bf16 %v782_v18, %v782_v18  ;;  %v731_v33 = vadd.f32 %v717_v21, %v1120_v24  ;;  %v737_v34 = vadd.f32 %v730_v19, %v1124_v32 }
 0x17a   : > { %v806_v36 = vsel %vm1145_vm6, %v791_v23, %v805_v17  ;;  %v792_v38 = vpack.c.bf16 %v785_v20, %v785_v20  ;;  %v767_v39 = vadd.f32 %v753_v9, %v739_v26 }
 0x17b   : > { %v790_v31 = vpack.c.bf16 %v783_v27, %v783_v27  ;;  %807 = vst [vmem:[%s1139_s23 + $0x8] sm:$0xf] %v806_v36  ;;  %v800_v40 = vsel %vm1145_vm6, %v789_v28, %v799_v25  ;;  %v738_v24 = vadd.f32 %v1122_v29, %v731_v33  ;;  %v765_v41 = vadd.f32 %v751_v14, %v737_v34  ;;  %v817_v29 = vld [vmem:[%s1139_s23 + $0x18] sm:$0xf] }
 0x17c   : > { %801 = vst [vmem:[%s1139_s23] sm:$0xf] %v800_v40  ;;  %v809_v32 = vsel %vm1145_vm6, %v792_v38, %v808_v30  ;;  %v781_v42 = vadd.f32 %v908_v57, %v767_v39 }
 0x17d   : > { %v803_v37 = vsel %vm1145_vm6, %v790_v31, %v802_v35  ;;  %810 = vst [vmem:[%s1139_s23 + $0xc] sm:$0xf] %v809_v32  ;;  %v766_v43 = vadd.f32 %v752_v22, %v738_v24  ;;  %v779_v44 = vadd.f32 %v908_v57, %v765_v41 }
 0x17e   : > { %804 = vst [vmem:[%s1139_s23 + $0x4] sm:$0xf] %v803_v37  ;;  %v788_v45 = vmax.f32 %v781_v42, 0.0 }
 0x17f   : > { %v780_v46 = vadd.f32 %v908_v57, %v766_v43  ;;  %v786_v47 = vmax.f32 %v779_v44, 0.0 }
 0x180   : > { %v795_v48 = vpack.c.bf16 %v788_v45, %v788_v45 }
 0x181   : > { %v787_v50 = vmax.f32 %v780_v46, 0.0  ;;  %v793_v51 = vpack.c.bf16 %v786_v47, %v786_v47 }
 0x182   : > { %v818_v53 = vsel %vm1145_vm6, %v795_v48, %v817_v29 }
 0x183   : > { %v794_v54 = vpack.c.bf16 %v787_v50, %v787_v50  ;;  %819 = vst [vmem:[%s1139_s23 + $0x18] sm:$0xf] %v818_v53  ;;  %v812_v55 = vsel %vm1145_vm6, %v793_v51, %v811_v49 }
 0x184   : > { %813 = vst [vmem:[%s1139_s23 + $0x10] sm:$0xf] %v812_v55 }
 0x185   : > { %v815_v56 = vsel %vm1145_vm6, %v794_v54, %v814_v52 }
 0x186   : > { %816 = vst [vmem:[%s1139_s23 + $0x14] sm:$0xf] %v815_v56 }
 0x187 PF: > { %s17_s24 = sadd.s32 1, %s1022_s24  }
 0x188   : > { %p14_p4 = scmp.ge.s32.totalorder %s17_s24, 4  }
 0x18a   :  { %16 = sbr.rel (!%p14_p4) target bundleno = 1 (0x1), region = 78 }

</bundles_post_ra>
